<compile_context>
chip_gen: v5e
topology: v5e:2x2
jax: 0.10.0
libtpu: 0.0.40
codegen_flags: <defaults>
</compile_context>

<pallas_src>
import functools

import jax
import jax.numpy as jnp
from jax.experimental import pallas as pl
from jax.experimental.pallas import tpu as pltpu

# ---- tiling / compiler knobs -------------------------------------------------
_TM_TARGET = 256                 # token-row tile target (v6e/v7x MXU is 256x256)
_TH_TARGET = 512                 # hidden-dim (4*n_embd) reduction tile target
_VMEM_LIMIT = 48 * 1024 * 1024   # raised scoped-VMEM limit; <=48 MiB also safe on v7x
_LN_EPS = 1e-5                   # PyTorch nn.LayerNorm default


def _round_up(n, m):
    return (n + m - 1) // m * m


def _row_tile(m, target=_TM_TARGET):
    # Largest row tile <= target, multiple of the f32 sublane tile (8), without
    # forcing large padding for tiny token counts.
    return min(target, max(8, _round_up(m, 8)))


def _col_tile(n, target=_TH_TARGET, mult=128):
    # Largest lane-dense (multiple-of-128) tile <= target that divides n, else n.
    if n <= target:
        return n
    t = (target // mult) * mult
    while t >= mult:
        if n % t == 0:
            return t
        t -= mult
    return n


def _pad_rows(x2, mp):
    # TODO(synk): mask the tail row tile in-kernel instead of jnp.pad for very large M.
    m = x2.shape[0]
    return x2 if m == mp else jnp.pad(x2, ((0, mp - m), (0, 0)))


def _layernorm_f32(z, g, b, eps):
    mean = jnp.mean(z, axis=-1, keepdims=True)
    zc = z - mean
    var = jnp.mean(zc * zc, axis=-1, keepdims=True)
    inv = jax.lax.rsqrt(var + eps)
    return zc * inv * g + b


# ---------------------------------------------------------------------------
# Bias-free linear: y = x @ W   (fused QKV projection; heads have no bias)
# ---------------------------------------------------------------------------
def _linear_nobias_kernel(x_ref, w_ref, o_ref):
    x = x_ref[...].astype(w_ref.dtype)               # bf16 MXU inputs
    o_ref[...] = jnp.dot(x, w_ref[...],
                         preferred_element_type=jnp.float32).astype(o_ref.dtype)


def _linear_nobias(x2, w):
    M, K = x2.shape
    N = w.shape[1]
    tm = _row_tile(M)
    tn = _col_tile(N)
    mp = _round_up(M, tm)
    xp = _pad_rows(x2, mp)
    out = pl.pallas_call(
        _linear_nobias_kernel,
        out_shape=jax.ShapeDtypeStruct((mp, N), jnp.float32),
        grid_spec=pltpu.PrefetchScalarGridSpec(
            num_scalar_prefetch=0,
            grid=(mp // tm, N // tn),
            in_specs=[
                pl.BlockSpec((tm, K), lambda i, j: (i, 0)),
                pl.BlockSpec((K, tn), lambda i, j: (0, j)),
            ],
            out_specs=pl.BlockSpec((tm, tn), lambda i, j: (i, j)),
        ),
        compiler_params=pltpu.CompilerParams(
            dimension_semantics=("parallel", "parallel"),
            vmem_limit_bytes=_VMEM_LIMIT),
    )(xp, w)
    return out[:M] if mp != M else out


# ---------------------------------------------------------------------------
# Per-(batch, head) causal softmax attention: softmax(q k^T / sqrt(hs)) @ v
# ---------------------------------------------------------------------------
def _attn_kernel(q_ref, k_ref, v_ref, o_ref, *, scale, compute_dtype):
    q = q_ref[...][0, 0].astype(compute_dtype)        # (T, hs)
    k = k_ref[...][0, 0].astype(compute_dtype)
    v = v_ref[...][0, 0].astype(compute_dtype)
    s = jax.lax.dot_general(q, k, (((1,), (1,)), ((), ())),
                            preferred_element_type=jnp.float32) * scale
    t = s.shape[0]
    row = jax.lax.broadcasted_iota(jnp.int32, (t, t), 0)
    col = jax.lax.broadcasted_iota(jnp.int32, (t, t), 1)
    s = jnp.where(col <= row, s, -1e30)                # causal mask
    s = s - jnp.max(s, axis=-1, keepdims=True)         # softmax in f32
    p = jnp.exp(s)
    p = p * pl.reciprocal(jnp.sum(p, axis=-1, keepdims=True), approx=False)
    # TODO(synk): training-mode attention dropout not wired in (eval semantics).
    o = jnp.dot(p.astype(compute_dtype), v, preferred_element_type=jnp.float32)
    o_ref[...] = o[None, None].astype(o_ref.dtype)


def _attention(q, k, v, *, compute_dtype):
    B, nH, T, hs = q.shape
    kern = functools.partial(_attn_kernel, scale=float(hs) ** -0.5,
                             compute_dtype=compute_dtype)
    spec = pl.BlockSpec((1, 1, T, hs), lambda b, h: (b, h, 0, 0))
    return pl.pallas_call(
        kern,
        out_shape=jax.ShapeDtypeStruct((B, nH, T, hs), jnp.float32),
        grid_spec=pltpu.PrefetchScalarGridSpec(
            num_scalar_prefetch=0,
            grid=(B, nH),
            in_specs=[spec, spec, spec],
            out_specs=spec,
        ),
        compiler_params=pltpu.CompilerParams(
            dimension_semantics=("parallel", "parallel"),
            vmem_limit_bytes=_VMEM_LIMIT),
    )(q, k, v)


# ---------------------------------------------------------------------------
# Fused: attention-output projection + bias + residual add + LayerNorm1
#   out = LN(x + attn @ Wp + bp)       (PyTorch LN defaults: eps=1e-5, affine)
# ---------------------------------------------------------------------------
def _proj_add_ln_kernel(attn_ref, w_ref, b_ref, x_ref, g_ref, beta_ref, o_ref, *, eps):
    a = attn_ref[...].astype(w_ref.dtype)              # bf16 MXU inputs
    sa = jnp.dot(a, w_ref[...], preferred_element_type=jnp.float32) + b_ref[...]
    # TODO(synk): training-mode dropout after the projection not wired in (eval semantics).
    z = x_ref[...].astype(jnp.float32) + sa
    o_ref[...] = _layernorm_f32(z, g_ref[...], beta_ref[...], eps).astype(o_ref.dtype)


def _proj_add_layernorm(attn2, w_proj, b_proj2d, x2, gamma2d, beta2d, eps=_LN_EPS):
    M, C = x2.shape
    tm = _row_tile(M)
    mp = _round_up(M, tm)
    ap, xp = _pad_rows(attn2, mp), _pad_rows(x2, mp)
    out = pl.pallas_call(
        functools.partial(_proj_add_ln_kernel, eps=eps),
        out_shape=jax.ShapeDtypeStruct((mp, C), jnp.float32),
        grid_spec=pltpu.PrefetchScalarGridSpec(
            num_scalar_prefetch=0,
            grid=(mp // tm,),
            in_specs=[
                pl.BlockSpec((tm, C), lambda i: (i, 0)),    # attn row tile
                pl.BlockSpec((C, C), lambda i: (0, 0)),     # W_proj
                pl.BlockSpec((1, C), lambda i: (0, 0)),     # b_proj
                pl.BlockSpec((tm, C), lambda i: (i, 0)),    # residual x row tile
                pl.BlockSpec((1, C), lambda i: (0, 0)),     # LN gamma
                pl.BlockSpec((1, C), lambda i: (0, 0)),     # LN beta
            ],
            out_specs=pl.BlockSpec((tm, C), lambda i: (i, 0)),
        ),
        compiler_params=pltpu.CompilerParams(
            dimension_semantics=("parallel",),
            vmem_limit_bytes=_VMEM_LIMIT),
    )(ap, w_proj, b_proj2d, xp, gamma2d, beta2d)
    return out[:M] if mp != M else out


# ---------------------------------------------------------------------------
# Fused: FeedForward (Linear(C,4C) -> ReLU -> Linear(4C,C)) + residual + LayerNorm2
# Tiled over token rows (parallel) and the hidden dim (arbitrary reduction) with a
# VMEM f32 accumulator; b2 + residual + LN applied once in the finalize step.
# ---------------------------------------------------------------------------
def _ffn_add_ln_kernel(x_ref, w1_ref, b1_ref, w2_ref, b2_ref, g_ref, beta_ref,
                       o_ref, acc_ref, *, eps):
    j = pl.program_id(1)

    @pl.when(j == 0)
    def _():
        acc_ref[...] = jnp.zeros_like(acc_ref)

    x = x_ref[...].astype(w1_ref.dtype)                 # bf16 MXU inputs
    h = jnp.dot(x, w1_ref[...], preferred_element_type=jnp.float32) + b1_ref[...]
    h = jnp.maximum(h, 0.0)                             # bias + ReLU kept in f32
    acc_ref[...] += jnp.dot(h.astype(w2_ref.dtype), w2_ref[...],
                            preferred_element_type=jnp.float32)

    @pl.when(j == pl.num_programs(1) - 1)
    def _():
        # TODO(synk): training-mode FFN dropout not wired in (eval semantics).
        z = x_ref[...].astype(jnp.float32) + acc_ref[...] + b2_ref[...]
        o_ref[...] = _layernorm_f32(z, g_ref[...], beta_ref[...], eps).astype(o_ref.dtype)


def _ffn_add_layernorm(x2, w1, b1_2d, w2, b2_2d, gamma2d, beta2d, eps=_LN_EPS):
    M, C = x2.shape
    H = w1.shape[1]
    tm = _row_tile(M)
    th = _col_tile(H)
    mp = _round_up(M, tm)
    xp = _pad_rows(x2, mp)
    out = pl.pallas_call(
        functools.partial(_ffn_add_ln_kernel, eps=eps),
        out_shape=jax.ShapeDtypeStruct((mp, C), jnp.float32),
        grid_spec=pltpu.PrefetchScalarGridSpec(
            num_scalar_prefetch=0,
            grid=(mp // tm, H // th),
            in_specs=[
                pl.BlockSpec((tm, C), lambda i, j: (i, 0)),   # x row tile (resident over j; also residual)
                pl.BlockSpec((C, th), lambda i, j: (0, j)),   # W1 hidden chunk
                pl.BlockSpec((1, th), lambda i, j: (0, j)),   # b1 hidden chunk
                pl.BlockSpec((th, C), lambda i, j: (j, 0)),   # W2 hidden chunk
                pl.BlockSpec((1, C), lambda i, j: (0, 0)),    # b2 (finalize only)
                pl.BlockSpec((1, C), lambda i, j: (0, 0)),    # LN gamma (finalize only)
                pl.BlockSpec((1, C), lambda i, j: (0, 0)),    # LN beta (finalize only)
            ],
            out_specs=pl.BlockSpec((tm, C), lambda i, j: (i, 0)),
            scratch_shapes=[pltpu.VMEM((tm, C), jnp.float32)],
        ),
        compiler_params=pltpu.CompilerParams(
            dimension_semantics=("parallel", "arbitrary"),
            vmem_limit_bytes=_VMEM_LIMIT),
    )(xp, w1, b1_2d, w2, b2_2d, gamma2d, beta2d)
    return out[:M] if mp != M else out


# ---------------------------------------------------------------------------
# Full Block forward
# ---------------------------------------------------------------------------
@functools.partial(jax.jit, static_argnames=("n_head", "compute_dtype"))
def block_forward(x, params, n_head, compute_dtype=jnp.bfloat16):
    """Forward of the PyTorch Block (eval mode: dropout = identity).
    x: (B, T, n_embd) float32."""
    B, T, C = x.shape
    hs = C // n_head
    M = B * T
    cd = compute_dtype
    x2 = x.reshape(M, C).astype(jnp.float32)

    # bf16 MXU inputs (f32 accumulation); biases / LN params stay f32.
    w_qkv = params["w_qkv"].astype(cd)
    w_proj = params["w_proj"].astype(cd)
    w1 = params["w1"].astype(cd)
    w2 = params["w2"].astype(cd)

    # ---- multi-head causal self-attention ----
    qkv = _linear_nobias(x2, w_qkv)                    # heads have no bias
    q, k, v = jnp.split(qkv, 3, axis=1)

    def split_heads(a):
        return a.reshape(B, T, n_head, hs).transpose(0, 2, 1, 3)

    attn = _attention(split_heads(q), split_heads(k), split_heads(v),
                      compute_dtype=cd)                # (B, nH, T, hs)
    attn2 = attn.transpose(0, 2, 1, 3).reshape(M, C)

    # ---- fused: sa projection + residual + ln1 ----
    h1 = _proj_add_layernorm(attn2, w_proj, params["b_proj"].reshape(1, C),
                             x2, params["g1"].reshape(1, C),
                             params["beta1"].reshape(1, C))

    # ---- fused: feed-forward + residual + ln2 ----
    out = _ffn_add_layernorm(h1, w1, params["b1"].reshape(1, -1),
                             w2, params["b2"].reshape(1, C),
                             params["g2"].reshape(1, C),
                             params["beta2"].reshape(1, C))
    return out.reshape(B, T, C).astype(x.dtype)


def init_params(key, n_embd, dtype=jnp.float32):
    """Uniform(+/- 1/sqrt(fan_in)) init mirroring nn.Linear defaults; LayerNorm = (1, 0)."""
    h = 4 * n_embd
    ks = jax.random.split(key, 7)
    lim_c = 1.0 / (n_embd ** 0.5)
    lim_h = 1.0 / (h ** 0.5)
    return dict(
        w_qkv=jax.random.uniform(ks[0], (n_embd, 3 * n_embd), dtype, -lim_c, lim_c),
        w_proj=jax.random.uniform(ks[1], (n_embd, n_embd), dtype, -lim_c, lim_c),
        b_proj=jax.random.uniform(ks[2], (n_embd,), dtype, -lim_c, lim_c),
        w1=jax.random.uniform(ks[3], (n_embd, h), dtype, -lim_c, lim_c),
        b1=jax.random.uniform(ks[4], (h,), dtype, -lim_c, lim_c),
        w2=jax.random.uniform(ks[5], (h, n_embd), dtype, -lim_h, lim_h),
        b2=jax.random.uniform(ks[6], (n_embd,), dtype, -lim_h, lim_h),
        g1=jnp.ones((n_embd,), dtype), beta1=jnp.zeros((n_embd,), dtype),
        g2=jnp.ones((n_embd,), dtype), beta2=jnp.zeros((n_embd,), dtype),
    )


def block_reference(x, params, n_head, compute_dtype=jnp.bfloat16):
    """Pure-JAX reference mirroring the kernels' dtype handling (bf16 MXU inputs,
    f32 accumulation).  With compute_dtype=float32 it is the exact f32 PyTorch forward."""
    B, T, C = x.shape
    hs = C // n_head
    cd = compute_dtype
    x2 = x.reshape(B * T, C).astype(jnp.float32)

    def mm(a, w):
        return jnp.dot(a.astype(cd), w.astype(cd), preferred_element_type=jnp.float32)

    def ln(z, g, b, eps=_LN_EPS):
        mean = jnp.mean(z, axis=-1, keepdims=True)
        zc = z - mean
        var = jnp.mean(zc * zc, axis=-1, keepdims=True)
        return zc * jax.lax.rsqrt(var + eps) * g + b

    qkv = mm(x2, params["w_qkv"])
    q, k, v = jnp.split(qkv, 3, axis=1)

    def split_heads(a):
        return a.reshape(B, T, n_head, hs).transpose(0, 2, 1, 3)

    q, k, v = split_heads(q), split_heads(k), split_heads(v)
    s = jnp.einsum("bhqd,bhkd->bhqk", q.astype(cd), k.astype(cd),
                   preferred_element_type=jnp.float32) * (hs ** -0.5)
    mask = (jax.lax.broadcasted_iota(jnp.int32, (T, T), 1)
            <= jax.lax.broadcasted_iota(jnp.int32, (T, T), 0))
    s = jnp.where(mask, s, -1e30)
    s = s - jnp.max(s, axis=-1, keepdims=True)
    p = jnp.exp(s)
    p = p / jnp.sum(p, axis=-1, keepdims=True)
    attn = jnp.einsum("bhqk,bhkd->bhqd", p.astype(cd), v.astype(cd),
                      preferred_element_type=jnp.float32)
    attn = attn.transpose(0, 2, 1, 3).reshape(B * T, C)
    sa = mm(attn, params["w_proj"]) + params["b_proj"]

    h1 = ln(x2 + sa, params["g1"], params["beta1"])
    h = jnp.maximum(mm(h1, params["w1"]) + params["b1"], 0.0)
    ff = jnp.dot(h.astype(cd), params["w2"].astype(cd),
                 preferred_element_type=jnp.float32) + params["b2"]
    out = ln(h1 + ff, params["g2"], params["beta2"])
    return out.reshape(B, T, C)


if __name__ == "__main__":
    key = jax.random.PRNGKey(0)
    B, T, n_embd, n_head = 2, 8, 32, 4   # small shapes; hidden = 4*n_embd = 128

    kx, kp = jax.random.split(key)
    x = jax.random.normal(kx, (B, T, n_embd), jnp.float32)
    params = init_params(kp, n_embd)

    y = block_forward(x, params, n_head=n_head)
    jax.block_until_ready(y)

    ref = block_reference(x, params, n_head)
    err = float(jnp.max(jnp.abs(y - ref)))
    assert y.shape == x.shape
    assert jnp.allclose(y, ref, atol=2e-2, rtol=2e-2), f"mismatch vs reference, max|err|={err}"

    print("KERNEL_OK")
</pallas_src>

<mosaic_0001>
module attributes {stable_mosaic.version = 11 : i64} {
  func.func @_linear_nobias_kernel(%arg0: i32, %arg1: i32, %arg2: memref<16x32xf32, #tpu.memory_space<vmem>>, %arg3: memref<32x96xbf16, #tpu.memory_space<vmem>>, %arg4: memref<16x96xf32, #tpu.memory_space<vmem>>) attributes {dimension_semantics = [#tpu.dimension_semantics<parallel>, #tpu.dimension_semantics<parallel>], iteration_bounds = array<i64: 1, 1>, scalar_prefetch = 0 : i64, scratch_operands = 0 : i64, tpu.core_type = #tpu.core_type<tc>, window_params = [{transform_indices = @transform_0, window_bounds = array<i64: 16, 32>}, {transform_indices = @transform_1, window_bounds = array<i64: 32, 96>}, {transform_indices = @transform_2, window_bounds = array<i64: 16, 96>}]} {
    %c0 = arith.constant 0 : index
    %c0_0 = arith.constant 0 : index
    %0 = vector.load %arg2[%c0, %c0_0] : memref<16x32xf32, #tpu.memory_space<vmem>>, vector<16x32xf32>
    %1 = arith.truncf %0 : vector<16x32xf32> to vector<16x32xbf16>
    %c0_1 = arith.constant 0 : index
    %c0_2 = arith.constant 0 : index
    %2 = vector.load %arg3[%c0_1, %c0_2] : memref<32x96xbf16, #tpu.memory_space<vmem>>, vector<32x96xbf16>
    %cst = arith.constant dense<0.000000e+00> : vector<16x96xf32>
    %3 = tpu.matmul %1, %2, %cst {dimension_numbers = #tpu.dot_dimension_numbers<[1], [0], [0], [1], [0, 0, 1, 1], [], []>} : vector<16x32xbf16>, vector<32x96xbf16>, vector<16x96xf32> -> vector<16x96xf32>
    %c0_3 = arith.constant 0 : index
    %c0_4 = arith.constant 0 : index
    %4 = vector.load %arg4[%c0_3, %c0_4] : memref<16x96xf32, #tpu.memory_space<vmem>>, vector<16x96xf32>
    tpu.vector_store %arg4[%c0_3, %c0_4], %3 {strides = array<i32>} : memref<16x96xf32, #tpu.memory_space<vmem>>, vector<16x96xf32>,
    return
  }
  func.func @transform_0(%arg0: i32, %arg1: i32) -> (i32, i32) {
    %c0_i32 = arith.constant 0 : i32
    %c0_i32_0 = arith.constant 0 : i32
    return %arg0, %c0_i32 : i32, i32
  }
  func.func @transform_1(%arg0: i32, %arg1: i32) -> (i32, i32) {
    %c0_i32 = arith.constant 0 : i32
    %c0_i32_0 = arith.constant 0 : i32
    return %c0_i32, %arg1 : i32, i32
  }
  func.func @transform_2(%arg0: i32, %arg1: i32) -> (i32, i32) {
    %c0_i32 = arith.constant 0 : i32
    return %arg0, %arg1 : i32, i32
  }
}

module attributes {stable_mosaic.version = 11 : i64} {
  func.func @_attn_kernel(%arg0: i32, %arg1: i32, %arg2: memref<1x1x8x8xf32, #tpu.memory_space<vmem>>, %arg3: memref<1x1x8x8xf32, #tpu.memory_space<vmem>>, %arg4: memref<1x1x8x8xf32, #tpu.memory_space<vmem>>, %arg5: memref<1x1x8x8xf32, #tpu.memory_space<vmem>>) attributes {dimension_semantics = [#tpu.dimension_semantics<parallel>, #tpu.dimension_semantics<parallel>], iteration_bounds = array<i64: 2, 4>, scalar_prefetch = 0 : i64, scratch_operands = 0 : i64, tpu.core_type = #tpu.core_type<tc>, window_params = [{transform_indices = @transform_0, window_bounds = array<i64: 1, 1, 8, 8>}, {transform_indices = @transform_1, window_bounds = array<i64: 1, 1, 8, 8>}, {transform_indices = @transform_2, window_bounds = array<i64: 1, 1, 8, 8>}, {transform_indices = @transform_3, window_bounds = array<i64: 1, 1, 8, 8>}]} {
    %c0 = arith.constant 0 : index
    %c0_0 = arith.constant 0 : index
    %c0_1 = arith.constant 0 : index
    %c0_2 = arith.constant 0 : index
    %0 = vector.load %arg2[%c0, %c0_0, %c0_1, %c0_2] : memref<1x1x8x8xf32, #tpu.memory_space<vmem>>, vector<1x1x8x8xf32>
    %1 = vector.shape_cast %0 : vector<1x1x8x8xf32> to vector<8x8xf32>
    %2 = arith.truncf %1 : vector<8x8xf32> to vector<8x8xbf16>
    %c0_3 = arith.constant 0 : index
    %c0_4 = arith.constant 0 : index
    %c0_5 = arith.constant 0 : index
    %c0_6 = arith.constant 0 : index
    %3 = vector.load %arg3[%c0_3, %c0_4, %c0_5, %c0_6] : memref<1x1x8x8xf32, #tpu.memory_space<vmem>>, vector<1x1x8x8xf32>
    %4 = vector.shape_cast %3 : vector<1x1x8x8xf32> to vector<8x8xf32>
    %5 = arith.truncf %4 : vector<8x8xf32> to vector<8x8xbf16>
    %c0_7 = arith.constant 0 : index
    %c0_8 = arith.constant 0 : index
    %c0_9 = arith.constant 0 : index
    %c0_10 = arith.constant 0 : index
    %6 = vector.load %arg4[%c0_7, %c0_8, %c0_9, %c0_10] : memref<1x1x8x8xf32, #tpu.memory_space<vmem>>, vector<1x1x8x8xf32>
    %7 = vector.shape_cast %6 : vector<1x1x8x8xf32> to vector<8x8xf32>
    %8 = arith.truncf %7 : vector<8x8xf32> to vector<8x8xbf16>
    %cst = arith.constant dense<0.000000e+00> : vector<8x8xf32>
    %9 = tpu.matmul %2, %5, %cst {dimension_numbers = #tpu.dot_dimension_numbers<[1], [1], [0], [0], [0, 0, 1, 0], [], []>} : vector<8x8xbf16>, vector<8x8xbf16>, vector<8x8xf32> -> vector<8x8xf32>
    %cst_11 = arith.constant 0.353553385 : f32
    %10 = vector.broadcast %cst_11 : f32 to vector<8x8xf32>
    %11 = arith.mulf %9, %10 : vector<8x8xf32>
    %12 = tpu.iota {dimensions = array<i32: 0>} : vector<8x8xi32>
    %13 = tpu.iota {dimensions = array<i32: 1>} : vector<8x8xi32>
    %14 = arith.cmpi sle, %13, %12 : vector<8x8xi32>
    %cst_12 = arith.constant -1.000000e+30 : f32
    %15 = vector.broadcast %cst_12 : f32 to vector<8x8xf32>
    %16 = arith.select %14, %11, %15 : vector<8x8xi1>, vector<8x8xf32>
    %cst_13 = arith.constant dense<0xFF800000> : vector<8xf32>
    %17 = vector.multi_reduction <maximumf>, %16, %cst_13 [1] : vector<8x8xf32> to vector<8xf32>
    %18 = vector.shape_cast %17 : vector<8xf32> to vector<8x1xf32>
    %19 = vector.broadcast %18 : vector<8x1xf32> to vector<8x8xf32>
    %20 = arith.subf %16, %19 : vector<8x8xf32>
    %21 = math.exp %20 : vector<8x8xf32>
    %cst_14 = arith.constant dense<0.000000e+00> : vector<8xf32>
    %22 = vector.multi_reduction <add>, %21, %cst_14 [1] : vector<8x8xf32> to vector<8xf32>
    %23 = vector.shape_cast %22 : vector<8xf32> to vector<8x1xf32>
    %24 = tpu.reciprocal %23 : vector<8x1xf32> -> vector<8x1xf32>
    %25 = vector.broadcast %24 : vector<8x1xf32> to vector<8x8xf32>
    %26 = arith.mulf %21, %25 : vector<8x8xf32>
    %27 = arith.truncf %26 : vector<8x8xf32> to vector<8x8xbf16>
    %cst_15 = arith.constant dense<0.000000e+00> : vector<8x8xf32>
    %28 = tpu.matmul %27, %8, %cst_15 {dimension_numbers = #tpu.dot_dimension_numbers<[1], [0], [0], [1], [0, 0, 1, 1], [], []>} : vector<8x8xbf16>, vector<8x8xbf16>, vector<8x8xf32> -> vector<8x8xf32>
    %29 = vector.shape_cast %28 : vector<8x8xf32> to vector<1x1x8x8xf32>
    %c0_16 = arith.constant 0 : index
    %c0_17 = arith.constant 0 : index
    %c0_18 = arith.constant 0 : index
    %c0_19 = arith.constant 0 : index
    %30 = vector.load %arg5[%c0_16, %c0_17, %c0_18, %c0_19] : memref<1x1x8x8xf32, #tpu.memory_space<vmem>>, vector<1x1x8x8xf32>
    tpu.vector_store %arg5[%c0_16, %c0_17, %c0_18, %c0_19], %29 {strides = array<i32>} : memref<1x1x8x8xf32, #tpu.memory_space<vmem>>, vector<1x1x8x8xf32>,
    return
  }
  func.func @transform_0(%arg0: i32, %arg1: i32) -> (i32, i32, i32, i32) {
    %c0_i32 = arith.constant 0 : i32
    %c0_i32_0 = arith.constant 0 : i32
    %c0_i32_1 = arith.constant 0 : i32
    return %arg0, %arg1, %c0_i32, %c0_i32_0 : i32, i32, i32, i32
  }
  func.func @transform_1(%arg0: i32, %arg1: i32) -> (i32, i32, i32, i32) {
    %c0_i32 = arith.constant 0 : i32
    %c0_i32_0 = arith.constant 0 : i32
    %c0_i32_1 = arith.constant 0 : i32
    return %arg0, %arg1, %c0_i32, %c0_i32_0 : i32, i32, i32, i32
  }
  func.func @transform_2(%arg0: i32, %arg1: i32) -> (i32, i32, i32, i32) {
    %c0_i32 = arith.constant 0 : i32
    %c0_i32_0 = arith.constant 0 : i32
    %c0_i32_1 = arith.constant 0 : i32
    return %arg0, %arg1, %c0_i32, %c0_i32_0 : i32, i32, i32, i32
  }
  func.func @transform_3(%arg0: i32, %arg1: i32) -> (i32, i32, i32, i32) {
    %c0_i32 = arith.constant 0 : i32
    %c0_i32_0 = arith.constant 0 : i32
    %c0_i32_1 = arith.constant 0 : i32
    return %arg0, %arg1, %c0_i32, %c0_i32_0 : i32, i32, i32, i32
  }
}

module attributes {stable_mosaic.version = 11 : i64} {
  func.func @_proj_add_ln_kernel(%arg0: i32, %arg1: memref<16x32xf32, #tpu.memory_space<vmem>>, %arg2: memref<32x32xbf16, #tpu.memory_space<vmem>>, %arg3: memref<1x32xf32, #tpu.memory_space<vmem>>, %arg4: memref<16x32xf32, #tpu.memory_space<vmem>>, %arg5: memref<1x32xf32, #tpu.memory_space<vmem>>, %arg6: memref<1x32xf32, #tpu.memory_space<vmem>>, %arg7: memref<16x32xf32, #tpu.memory_space<vmem>>) attributes {dimension_semantics = [#tpu.dimension_semantics<parallel>], iteration_bounds = array<i64: 1>, scalar_prefetch = 0 : i64, scratch_operands = 0 : i64, tpu.core_type = #tpu.core_type<tc>, window_params = [{transform_indices = @transform_0, window_bounds = array<i64: 16, 32>}, {pipeline_mode = #tpu.pipeline_mode<synchronous>, transform_indices = @transform_1, window_bounds = array<i64: 32, 32>}, {pipeline_mode = #tpu.pipeline_mode<synchronous>, transform_indices = @transform_2, window_bounds = array<i64: 1, 32>}, {transform_indices = @transform_3, window_bounds = array<i64: 16, 32>}, {pipeline_mode = #tpu.pipeline_mode<synchronous>, transform_indices = @transform_4, window_bounds = array<i64: 1, 32>}, {pipeline_mode = #tpu.pipeline_mode<synchronous>, transform_indices = @transform_5, window_bounds = array<i64: 1, 32>}, {transform_indices = @transform_6, window_bounds = array<i64: 16, 32>}]} {
    %c0 = arith.constant 0 : index
    %c0_0 = arith.constant 0 : index
    %0 = vector.load %arg1[%c0, %c0_0] : memref<16x32xf32, #tpu.memory_space<vmem>>, vector<16x32xf32>
    %1 = arith.truncf %0 : vector<16x32xf32> to vector<16x32xbf16>
    %c0_1 = arith.constant 0 : index
    %c0_2 = arith.constant 0 : index
    %2 = vector.load %arg2[%c0_1, %c0_2] : memref<32x32xbf16, #tpu.memory_space<vmem>>, vector<32x32xbf16>
    %cst = arith.constant dense<0.000000e+00> : vector<16x32xf32>
    %3 = tpu.matmul %1, %2, %cst {dimension_numbers = #tpu.dot_dimension_numbers<[1], [0], [0], [1], [0, 0, 1, 1], [], []>} : vector<16x32xbf16>, vector<32x32xbf16>, vector<16x32xf32> -> vector<16x32xf32>
    %c0_3 = arith.constant 0 : index
    %c0_4 = arith.constant 0 : index
    %4 = vector.load %arg3[%c0_3, %c0_4] : memref<1x32xf32, #tpu.memory_space<vmem>>, vector<1x32xf32>
    %5 = vector.broadcast %4 : vector<1x32xf32> to vector<16x32xf32>
    %6 = arith.addf %3, %5 : vector<16x32xf32>
    %c0_5 = arith.constant 0 : index
    %c0_6 = arith.constant 0 : index
    %7 = vector.load %arg4[%c0_5, %c0_6] : memref<16x32xf32, #tpu.memory_space<vmem>>, vector<16x32xf32>
    %8 = arith.addf %7, %6 : vector<16x32xf32>
    %c0_7 = arith.constant 0 : index
    %c0_8 = arith.constant 0 : index
    %9 = vector.load %arg5[%c0_7, %c0_8] : memref<1x32xf32, #tpu.memory_space<vmem>>, vector<1x32xf32>
    %c0_9 = arith.constant 0 : index
    %c0_10 = arith.constant 0 : index
    %10 = vector.load %arg6[%c0_9, %c0_10] : memref<1x32xf32, #tpu.memory_space<vmem>>, vector<1x32xf32>
    %cst_11 = arith.constant dense<0.000000e+00> : vector<16xf32>
    %11 = vector.multi_reduction <add>, %8, %cst_11 [1] : vector<16x32xf32> to vector<16xf32>
    %12 = vector.shape_cast %11 : vector<16xf32> to vector<16x1xf32>
    %cst_12 = arith.constant 3.200000e+01 : f32
    %13 = vector.broadcast %cst_12 : f32 to vector<16x1xf32>
    %14 = arith.divf %12, %13 : vector<16x1xf32>
    %15 = vector.broadcast %14 : vector<16x1xf32> to vector<16x32xf32>
    %16 = arith.subf %8, %15 : vector<16x32xf32>
    %17 = arith.mulf %16, %16 : vector<16x32xf32>
    %cst_13 = arith.constant dense<0.000000e+00> : vector<16xf32>
    %18 = vector.multi_reduction <add>, %17, %cst_13 [1] : vector<16x32xf32> to vector<16xf32>
    %19 = vector.shape_cast %18 : vector<16xf32> to vector<16x1xf32>
    %cst_14 = arith.constant 3.200000e+01 : f32
    %20 = vector.broadcast %cst_14 : f32 to vector<16x1xf32>
    %21 = arith.divf %19, %20 : vector<16x1xf32>
    %cst_15 = arith.constant 9.99999974E-6 : f32
    %22 = vector.broadcast %cst_15 : f32 to vector<16x1xf32>
    %23 = arith.addf %21, %22 : vector<16x1xf32>
    %24 = math.rsqrt %23 : vector<16x1xf32>
    %25 = vector.broadcast %24 : vector<16x1xf32> to vector<16x32xf32>
    %26 = arith.mulf %16, %25 : vector<16x32xf32>
    %27 = vector.broadcast %9 : vector<1x32xf32> to vector<16x32xf32>
    %28 = arith.mulf %26, %27 : vector<16x32xf32>
    %29 = vector.broadcast %10 : vector<1x32xf32> to vector<16x32xf32>
    %30 = arith.addf %28, %29 : vector<16x32xf32>
    %c0_16 = arith.constant 0 : index
    %c0_17 = arith.constant 0 : index
    %31 = vector.load %arg7[%c0_16, %c0_17] : memref<16x32xf32, #tpu.memory_space<vmem>>, vector<16x32xf32>
    tpu.vector_store %arg7[%c0_16, %c0_17], %30 {strides = array<i32>} : memref<16x32xf32, #tpu.memory_space<vmem>>, vector<16x32xf32>,
    return
  }
  func.func @transform_0(%arg0: i32) -> (i32, i32) {
    %c0_i32 = arith.constant 0 : i32
    %c0_i32_0 = arith.constant 0 : i32
    return %arg0, %c0_i32 : i32, i32
  }
  func.func @transform_1(%arg0: i32) -> (i32, i32) {
    %c0_i32 = arith.constant 0 : i32
    %c0_i32_0 = arith.constant 0 : i32
    %c0_i32_1 = arith.constant 0 : i32
    return %c0_i32, %c0_i32_0 : i32, i32
  }
  func.func @transform_2(%arg0: i32) -> (i32, i32) {
    %c0_i32 = arith.constant 0 : i32
    %c0_i32_0 = arith.constant 0 : i32
    %c0_i32_1 = arith.constant 0 : i32
    return %c0_i32, %c0_i32_0 : i32, i32
  }
  func.func @transform_3(%arg0: i32) -> (i32, i32) {
    %c0_i32 = arith.constant 0 : i32
    %c0_i32_0 = arith.constant 0 : i32
    return %arg0, %c0_i32 : i32, i32
  }
  func.func @transform_4(%arg0: i32) -> (i32, i32) {
    %c0_i32 = arith.constant 0 : i32
    %c0_i32_0 = arith.constant 0 : i32
    %c0_i32_1 = arith.constant 0 : i32
    return %c0_i32, %c0_i32_0 : i32, i32
  }
  func.func @transform_5(%arg0: i32) -> (i32, i32) {
    %c0_i32 = arith.constant 0 : i32
    %c0_i32_0 = arith.constant 0 : i32
    %c0_i32_1 = arith.constant 0 : i32
    return %c0_i32, %c0_i32_0 : i32, i32
  }
  func.func @transform_6(%arg0: i32) -> (i32, i32) {
    %c0_i32 = arith.constant 0 : i32
    %c0_i32_0 = arith.constant 0 : i32
    return %arg0, %c0_i32 : i32, i32
  }
}

module attributes {stable_mosaic.version = 11 : i64} {
  func.func @_ffn_add_ln_kernel(%arg0: i32, %arg1: i32, %arg2: memref<16x32xf32, #tpu.memory_space<vmem>>, %arg3: memref<32x128xbf16, #tpu.memory_space<vmem>>, %arg4: memref<1x128xf32, #tpu.memory_space<vmem>>, %arg5: memref<128x32xbf16, #tpu.memory_space<vmem>>, %arg6: memref<1x32xf32, #tpu.memory_space<vmem>>, %arg7: memref<1x32xf32, #tpu.memory_space<vmem>>, %arg8: memref<1x32xf32, #tpu.memory_space<vmem>>, %arg9: memref<16x32xf32, #tpu.memory_space<vmem>>, %arg10: memref<16x32xf32, #tpu.memory_space<vmem>>) attributes {dimension_semantics = [#tpu.dimension_semantics<parallel>, #tpu.dimension_semantics<arbitrary>], iteration_bounds = array<i64: 1, 1>, scalar_prefetch = 0 : i64, scratch_operands = 1 : i64, tpu.core_type = #tpu.core_type<tc>, window_params = [{transform_indices = @transform_0, window_bounds = array<i64: 16, 32>}, {transform_indices = @transform_1, window_bounds = array<i64: 32, 128>}, {transform_indices = @transform_2, window_bounds = array<i64: 1, 128>}, {transform_indices = @transform_3, window_bounds = array<i64: 128, 32>}, {pipeline_mode = #tpu.pipeline_mode<synchronous>, transform_indices = @transform_4, window_bounds = array<i64: 1, 32>}, {pipeline_mode = #tpu.pipeline_mode<synchronous>, transform_indices = @transform_5, window_bounds = array<i64: 1, 32>}, {pipeline_mode = #tpu.pipeline_mode<synchronous>, transform_indices = @transform_6, window_bounds = array<i64: 1, 32>}, {transform_indices = @transform_7, window_bounds = array<i64: 16, 32>}]} {
    %c0_i32 = arith.constant 0 : i32
    %0 = arith.cmpi eq, %arg1, %c0_i32 : i32
    %1 = arith.extui %0 : i1 to i32
    %c0_i32_0 = arith.constant 0 : i32
    %2 = arith.cmpi ne, %1, %c0_i32_0 : i32
    scf.if %2 {
      %cst_16 = arith.constant 0.000000e+00 : f32
      %21 = vector.broadcast %cst_16 : f32 to vector<16x32xf32>
      %c0_17 = arith.constant 0 : index
      %c0_18 = arith.constant 0 : index
      %22 = vector.load %arg10[%c0_17, %c0_18] : memref<16x32xf32, #tpu.memory_space<vmem>>, vector<16x32xf32>
      tpu.vector_store %arg10[%c0_17, %c0_18], %21 {strides = array<i32>} : memref<16x32xf32, #tpu.memory_space<vmem>>, vector<16x32xf32>,
    } else {
    }
    %c0 = arith.constant 0 : index
    %c0_1 = arith.constant 0 : index
    %3 = vector.load %arg2[%c0, %c0_1] : memref<16x32xf32, #tpu.memory_space<vmem>>, vector<16x32xf32>
    %4 = arith.truncf %3 : vector<16x32xf32> to vector<16x32xbf16>
    %c0_2 = arith.constant 0 : index
    %c0_3 = arith.constant 0 : index
    %5 = vector.load %arg3[%c0_2, %c0_3] : memref<32x128xbf16, #tpu.memory_space<vmem>>, vector<32x128xbf16>
    %cst = arith.constant dense<0.000000e+00> : vector<16x128xf32>
    %6 = tpu.matmul %4, %5, %cst {dimension_numbers = #tpu.dot_dimension_numbers<[1], [0], [0], [1], [0, 0, 1, 1], [], []>} : vector<16x32xbf16>, vector<32x128xbf16>, vector<16x128xf32> -> vector<16x128xf32>
    %c0_4 = arith.constant 0 : index
    %c0_5 = arith.constant 0 : index
    %7 = vector.load %arg4[%c0_4, %c0_5] : memref<1x128xf32, #tpu.memory_space<vmem>>, vector<1x128xf32>
    %8 = vector.broadcast %7 : vector<1x128xf32> to vector<16x128xf32>
    %9 = arith.addf %6, %8 : vector<16x128xf32>
    %cst_6 = arith.constant 0.000000e+00 : f32
    %10 = vector.broadcast %cst_6 : f32 to vector<16x128xf32>
    %11 = arith.maximumf %9, %10 : vector<16x128xf32>
    %c0_7 = arith.constant 0 : index
    %c0_8 = arith.constant 0 : index
    %12 = vector.load %arg10[%c0_7, %c0_8] : memref<16x32xf32, #tpu.memory_space<vmem>>, vector<16x32xf32>
    %13 = arith.truncf %11 : vector<16x128xf32> to vector<16x128xbf16>
    %c0_9 = arith.constant 0 : index
    %c0_10 = arith.constant 0 : index
    %14 = vector.load %arg5[%c0_9, %c0_10] : memref<128x32xbf16, #tpu.memory_space<vmem>>, vector<128x32xbf16>
    %cst_11 = arith.constant dense<0.000000e+00> : vector<16x32xf32>
    %15 = tpu.matmul %13, %14, %cst_11 {dimension_numbers = #tpu.dot_dimension_numbers<[1], [0], [0], [1], [0, 0, 1, 1], [], []>} : vector<16x128xbf16>, vector<128x32xbf16>, vector<16x32xf32> -> vector<16x32xf32>
    %16 = arith.addf %12, %15 : vector<16x32xf32>
    %c0_12 = arith.constant 0 : index
    %c0_13 = arith.constant 0 : index
    %17 = vector.load %arg10[%c0_12, %c0_13] : memref<16x32xf32, #tpu.memory_space<vmem>>, vector<16x32xf32>
    tpu.vector_store %arg10[%c0_12, %c0_13], %16 {strides = array<i32>} : memref<16x32xf32, #tpu.memory_space<vmem>>, vector<16x32xf32>,
    %c0_i32_14 = arith.constant 0 : i32
    %18 = arith.cmpi eq, %arg1, %c0_i32_14 : i32
    %19 = arith.extui %18 : i1 to i32
    %c0_i32_15 = arith.constant 0 : i32
    %20 = arith.cmpi ne, %19, %c0_i32_15 : i32
    scf.if %20 {
      %c0_16 = arith.constant 0 : index
      %c0_17 = arith.constant 0 : index
      %21 = vector.load %arg2[%c0_16, %c0_17] : memref<16x32xf32, #tpu.memory_space<vmem>>, vector<16x32xf32>
      %c0_18 = arith.constant 0 : index
      %c0_19 = arith.constant 0 : index
      %22 = vector.load %arg10[%c0_18, %c0_19] : memref<16x32xf32, #tpu.memory_space<vmem>>, vector<16x32xf32>
      %23 = arith.addf %21, %22 : vector<16x32xf32>
      %c0_20 = arith.constant 0 : index
      %c0_21 = arith.constant 0 : index
      %24 = vector.load %arg6[%c0_20, %c0_21] : memref<1x32xf32, #tpu.memory_space<vmem>>, vector<1x32xf32>
      %25 = vector.broadcast %24 : vector<1x32xf32> to vector<16x32xf32>
      %26 = arith.addf %23, %25 : vector<16x32xf32>
      %c0_22 = arith.constant 0 : index
      %c0_23 = arith.constant 0 : index
      %27 = vector.load %arg7[%c0_22, %c0_23] : memref<1x32xf32, #tpu.memory_space<vmem>>, vector<1x32xf32>
      %c0_24 = arith.constant 0 : index
      %c0_25 = arith.constant 0 : index
      %28 = vector.load %arg8[%c0_24, %c0_25] : memref<1x32xf32, #tpu.memory_space<vmem>>, vector<1x32xf32>
      %cst_26 = arith.constant dense<0.000000e+00> : vector<16xf32>
      %29 = vector.multi_reduction <add>, %26, %cst_26 [1] : vector<16x32xf32> to vector<16xf32>
      %30 = vector.shape_cast %29 : vector<16xf32> to vector<16x1xf32>
      %cst_27 = arith.constant 3.200000e+01 : f32
      %31 = vector.broadcast %cst_27 : f32 to vector<16x1xf32>
      %32 = arith.divf %30, %31 : vector<16x1xf32>
      %33 = vector.broadcast %32 : vector<16x1xf32> to vector<16x32xf32>
      %34 = arith.subf %26, %33 : vector<16x32xf32>
      %35 = arith.mulf %34, %34 : vector<16x32xf32>
      %cst_28 = arith.constant dense<0.000000e+00> : vector<16xf32>
      %36 = vector.multi_reduction <add>, %35, %cst_28 [1] : vector<16x32xf32> to vector<16xf32>
      %37 = vector.shape_cast %36 : vector<16xf32> to vector<16x1xf32>
      %cst_29 = arith.constant 3.200000e+01 : f32
      %38 = vector.broadcast %cst_29 : f32 to vector<16x1xf32>
      %39 = arith.divf %37, %38 : vector<16x1xf32>
      %cst_30 = arith.constant 9.99999974E-6 : f32
      %40 = vector.broadcast %cst_30 : f32 to vector<16x1xf32>
      %41 = arith.addf %39, %40 : vector<16x1xf32>
      %42 = math.rsqrt %41 : vector<16x1xf32>
      %43 = vector.broadcast %42 : vector<16x1xf32> to vector<16x32xf32>
      %44 = arith.mulf %34, %43 : vector<16x32xf32>
      %45 = vector.broadcast %27 : vector<1x32xf32> to vector<16x32xf32>
      %46 = arith.mulf %44, %45 : vector<16x32xf32>
      %47 = vector.broadcast %28 : vector<1x32xf32> to vector<16x32xf32>
      %48 = arith.addf %46, %47 : vector<16x32xf32>
      %c0_31 = arith.constant 0 : index
      %c0_32 = arith.constant 0 : index
      %49 = vector.load %arg9[%c0_31, %c0_32] : memref<16x32xf32, #tpu.memory_space<vmem>>, vector<16x32xf32>
      tpu.vector_store %arg9[%c0_31, %c0_32], %48 {strides = array<i32>} : memref<16x32xf32, #tpu.memory_space<vmem>>, vector<16x32xf32>,
    } else {
    }
    return
  }
  func.func @transform_0(%arg0: i32, %arg1: i32) -> (i32, i32) {
    %c0_i32 = arith.constant 0 : i32
    %c0_i32_0 = arith.constant 0 : i32
    return %arg0, %c0_i32 : i32, i32
  }
  func.func @transform_1(%arg0: i32, %arg1: i32) -> (i32, i32) {
    %c0_i32 = arith.constant 0 : i32
    %c0_i32_0 = arith.constant 0 : i32
    return %c0_i32, %arg1 : i32, i32
  }
  func.func @transform_2(%arg0: i32, %arg1: i32) -> (i32, i32) {
    %c0_i32 = arith.constant 0 : i32
    %c0_i32_0 = arith.constant 0 : i32
    return %c0_i32, %arg1 : i32, i32
  }
  func.func @transform_3(%arg0: i32, %arg1: i32) -> (i32, i32) {
    %c0_i32 = arith.constant 0 : i32
    %c0_i32_0 = arith.constant 0 : i32
    return %arg1, %c0_i32 : i32, i32
  }
  func.func @transform_4(%arg0: i32, %arg1: i32) -> (i32, i32) {
    %c0_i32 = arith.constant 0 : i32
    %c0_i32_0 = arith.constant 0 : i32
    %c0_i32_1 = arith.constant 0 : i32
    return %c0_i32, %c0_i32_0 : i32, i32
  }
  func.func @transform_5(%arg0: i32, %arg1: i32) -> (i32, i32) {
    %c0_i32 = arith.constant 0 : i32
    %c0_i32_0 = arith.constant 0 : i32
    %c0_i32_1 = arith.constant 0 : i32
    return %c0_i32, %c0_i32_0 : i32, i32
  }
  func.func @transform_6(%arg0: i32, %arg1: i32) -> (i32, i32) {
    %c0_i32 = arith.constant 0 : i32
    %c0_i32_0 = arith.constant 0 : i32
    %c0_i32_1 = arith.constant 0 : i32
    return %c0_i32, %c0_i32_0 : i32, i32
  }
  func.func @transform_7(%arg0: i32, %arg1: i32) -> (i32, i32) {
    %c0_i32 = arith.constant 0 : i32
    %c0_i32_0 = arith.constant 0 : i32
    return %arg0, %c0_i32 : i32, i32
  }
}

</mosaic_0001>

<bundles_post_ra>
// kernel: block_forward.4
= control target key start
LH: loop header
LB: loop body
LE: loop exit
PB: predicated region body
PF: predicated region fallthrough
CT: control target
= control target key end

     0   :  { %vm31_vm0 = vcmask 261120   ;;  %vm49_vm1 = vcmask 785408   ;;  %s100_s1 = inlined_call_operand.vmem [shape: bf16[32,96], index: 1, kind: input, shape index: {}]   ;;  %s101_s0 = inlined_call_operand.vmem [shape: f32[16,32], index: 0, kind: input, shape index: {}]   ;;  %s102_s2 = inlined_call_operand.vmem [shape: f32[16,96], index: 2, kind: output, shape index: {}]  }
   0x1   :  { %v66_v0 = vld [vmem:[%s100_s1 + $0x8] sm:$0xff]  ;;  %v65_v1 = vld [vmem:[%s100_s1] sm:$0xff] }
   0x2   :  { %41 = vmatpush.bf16.msra.mxu0 %v66_v0  ;;  %v12_v2 = vld [vmem:[%s101_s0] sm:$0xff]  ;;  %v13_v3 = vld [vmem:[%s101_s0 + $0x8] sm:$0xff] }
   0x3   :  { %v14_v4 = vpack.c.bf16 %v13_v3, %v12_v2 }
   0x6   :  { %42 = vmatpush.bf16.msra.mxu0 %v65_v1 }
   0x9   :  { %64 = vmatmul.msk.bf16.vlgmr.msra.gmra.mxu0 %vm31_vm0, %v14_v4 }
  0x86   :  { %v44_v5 = vpop.f32.mrf.mxu0 }
  0x87   :  { %50 = vst.msk [vmem:[%s102_s2] sm:$0xff] %vm49_vm1, %v44_v5 }
  0x8e   :  { %v46_v6 = vpop.f32.mrf.mxu0 }
  0x8f   :  { %51 = vst.msk [vmem:[%s102_s2 + $0x8] sm:$0xff] %vm49_vm1, %v46_v6 }

// kernel: block_forward.5
= control target key start
LH: loop header
LB: loop body
LE: loop exit
PB: predicated region body
PF: predicated region fallthrough
CT: control target
= control target key end

     0   :  { %s587_s12 = smov 0   ;;  %s589_s13 = smov 0   ;;  %s656_s0 = inlined_call_operand.vmem [shape: f32[2,4,8,8], index: 0, kind: input, shape index: {}]   ;;  %s657_s1 = inlined_call_operand.vmem [shape: f32[2,4,8,8], index: 1, kind: input, shape index: {}]   ;;  %s658_s2 = inlined_call_operand.vmem [shape: f32[2,4,8,8], index: 2, kind: input, shape index: {}]   ;;  %s659_s3 = inlined_call_operand.vmem [shape: f32[2,4,8,8], index: 3, kind: output, shape index: {}]  }
   0x1   :  { %s591_s14 = smov 0   ;;  %s593_s15 = smov 0  }
   0x2   :  { %s595_s16 = smov 0  }
   0x3 LB: > { %s22_s17 = sadd.s32 1, %s557_s14  ;;  %s25_s18 = sadd.s32 1, %s561_s15  ;;  %s565_s16 = sphi %s595_s16, %s13_s16   ;;  %s561_s15 = sphi %s593_s15, %s663_s15   ;;  %s557_s14 = sphi %s591_s14, %s662_s14   ;;  %s553_s13 = sphi %s589_s13, %s661_s13   ;;  %s549_s12 = sphi %s587_s12, %s660_s12  }
   0x4   : > { %p23_p0 = scmp.ge.s32.totalorder %s22_s17, 4  ;;  %p470_p1 = scmp.ge.s32.totalorder %s565_s16, 1 }
   0x5   : > { %p186_p2 = scmp.lt.s32.totalorder %s565_s16, 9 }
   0x6   : > { %s665_s17 = smov (%p23_p0, %s22_s17), 0  ;;  %s667_s18 = smov (!%p23_p0, %s25_s18), %s561_s15 }
   0x7   : > { %p187_p3 = pnand %p470_p1, %p186_p2  ;;  %p27_p4 = scmp.ge.s32.totalorder %s667_s18, 2 }
   0x8   : > { %p232_p5 = scmp.lt.s32.totalorder (!%p187_p3), %s553_s13, 1  ;;  %p234_p6 = scmp.lt.s32.totalorder (!%p187_p3), %s549_s12, 3 }
   0x9   : > { %s669_s18 = smov (%p27_p4, %s667_s18), 0  ;;  %190 = sbr.rel (%p187_p3) target bundleno = 559 (0x22f), region = 32 }
   0xe   : > { %s671_s13 = smov (!%p232_p5, %s553_s13), 1  ;;  %s673_s12 = smov (!%p234_p6, %s549_s12), 3  ;;  %vm271_vm0 = vcmask 64512   ;;  %v292_v5 = vlaneseq  ;;  %vm326_vm2 = vcmask 1043456  }
   0xf   : > { %s471_s19 = sshll.u32 %s671_s13, 2 }
  0x10   : > { %s237_s20 = sadd.s32 %s471_s19, %s673_s12  ;;  %v293_v6 = vshrl.u32 %v292_v5, 7  ;;  %v295_v7 = vand.u32 127, %v292_v5 }
  0x11   : > { %s617_s21 = sshll.u32 %s237_s20, 3 }
  0x12   : > { %s247_s24 = scalar_lea.vmem %s657_s1, %s617_s21  ;;  %s239_s27 = scalar_lea.vmem %s656_s0, %s617_s21  ;;  %vm296_vm1 = vcmp.le.s32.totalorder %v295_v7, %v293_v6 }
  0x13   : > { %v267_v0 = vld [vmem:[%s247_s24] sm:$0xff]  ;;  %s255_s30 = scalar_lea.vmem %s658_s2, %s617_s21  ;;  %s263_s6 = scalar_lea.vmem %s659_s3, %s617_s21 }
  0x14   : > { %v268_v1 = vpack.c.bf16 %v267_v0, %v267_v0  ;;  %v265_v3 = vld [vmem:[%s239_s27] sm:$0xff] }
  0x15   : > { %v266_v4 = vpack.c.bf16 %v265_v3, %v265_v3  ;;  %v269_v18 = vld [vmem:[%s255_s30] sm:$0xff] }
  0x16   : > { %v276_v2 = vsel %vm271_vm0, %v268_v1, 0  ;;  %v270_v19 = vpack.c.bf16 %v269_v18, %v269_v18 }
  0x17   : > { %285 = vmatpush.bf16.xpose.msra.mxu0 %v276_v2 }
  0x18   : > { %v328_v20 = vsel %vm326_vm2, %v270_v19, 0 }
  0x19   : > { %337 = vmatpush.bf16.msra.mxu1 %v328_v20 }
  0x1e   : > { %479 = vmatmul.msk.bf16.vlgmr.msra.gmra.mxu0 %vm271_vm0, %v266_v4 }
  0x9b   : > { %v287_v8 = vpop.f32.mrf.mxu0 }
  0x9c   : > { %v291_v9 = vmul.f32 0.35355338, %v287_v8 }
  0x9e   : > { %v297_v10 = vsel %vm296_vm1, %v291_v9, -1e+30 }
  0x9f   : > { %v298_v11 = vsel %vm271_vm0, %v297_v10, -inf }
  0xa0   : > { %299 = vmax.xlane.f32.xlu0 %v298_v11 }
  0xa3   : > { %v289_v12 = vpop.f32.mrf.mxu0 }
 0x113   : > { %v300_v13 = vpop.xlane.xlu0 %299 }
 0x114   : > { %v301_v14 = vsub.f32 %v297_v10, %v300_v13 }
 0x116   : > { %v302_v15 = vmul.f32 1.442695, %v301_v14 }
 0x118   : > { %523 = vpow2.f32 %v302_v15 }
 0x11e   : > { %v524_v16 = vpop.eup %523 }
 0x11f   : > { %v304_v17 = vsel %vm271_vm0, %v524_v16, 0.0 }
 0x120   : > { %305 = vadd.xlane.f32.xlu0 %v304_v17 }
 0x193   : > { %v306_v21 = vpop.xlane.xlu0 %305 }
 0x194   : > { %525 = vrcp.f32 %v306_v21  ;;  %v318_v25 = vand.u32 2147483648, %v306_v21  ;;  %v316_v27 = vand.u32 2147483647, %v306_v21  ;;  %vm312_vm4 = vweird.f32 %v306_v21 }
 0x196   : > { %v319_v29 = vor.u32 1.1754944e-38, %v318_v25  ;;  %vm317_vm6 = vcmp.eq.f32.partialorder %v316_v27, 8.507059e+37 }
 0x19a   : > { %v526_v22 = vpop.eup %525 }
 0x19b   : > { %v308_v23 = vmul.f32 %v526_v22, %v306_v21  ;;  %vm313_vm3 = vweird.f32 %v526_v22 }
 0x19c   : > { %vm314_vm5 = vmor %vm312_vm4, %vm313_vm3 }
 0x19d   : > { %v309_v24 = vsub.f32 1.0, %v308_v23 }
 0x19f   : > { %v310_v26 = vmul.f32 %v526_v22, %v309_v24 }
 0x1a1   : > { %v311_v28 = vadd.f32 %v526_v22, %v310_v26 }
 0x1a3   : > { %v315_v30 = vsel %vm314_vm5, %v526_v22, %v311_v28 }
 0x1a4   : > { %v320_v31 = vsel %vm317_vm6, %v319_v29, %v315_v30 }
 0x1a5   : > { %v321_v32 = vmul.f32 %v524_v16, %v320_v31 }
 0x1a7   : > { %v322_v33 = vpack.c.bf16 %v321_v32, %v321_v32 }
 0x1a9   : > { %480 = vmatmul.msk.bf16.vlgmr.msra.gmra.mxu1 %vm271_vm0, %v322_v33 }
 0x226   : > { %v339_v34 = vpop.f32.mrf.mxu1 }
 0x227   : > { %343 = vst.msk [vmem:[%s263_s6] sm:$0xff] %vm271_vm0, %v339_v34 }
 0x22e   : > { %v341_v35 = vpop.f32.mrf.mxu1 }
 0x22f PF: > { %s13_s16 = sadd.s32 1, %s565_s16   ;;  %s660_s12 = smov %s557_s14 }
 0x230   : > { %p10_p7 = scmp.ge.s32.totalorder %s13_s16, 10   ;;  %s661_s13 = smov %s561_s15 }
 0x231   : > { %s662_s14 = smov %s665_s17  ;;  %s663_s15 = smov %s669_s18 }
 0x232   :  { %12 = sbr.rel (!%p10_p7) target bundleno = 3 (0x3), region = 68 }

// kernel: block_forward.6
= control target key start
LH: loop header
LB: loop body
LE: loop exit
PB: predicated region body
PF: predicated region fallthrough
CT: control target
= control target key end

     0   :  { %vm47_vm0 = vcmask 261120   ;;  %v159_v16 = vmov 32.0   ;;  %s235_s1 = inlined_call_operand.vmem [shape: bf16[32,32], index: 1, kind: input, shape index: {}]   ;;  %s236_s0 = inlined_call_operand.vmem [shape: f32[16,32], index: 0, kind: input, shape index: {}]   ;;  %s237_s2 = inlined_call_operand.vmem [shape: f32[1,32], index: 2, kind: input, shape index: {}]   ;;  %s238_s3 = inlined_call_operand.vmem [shape: f32[16,32], index: 3, kind: input, shape index: {}]   ;;  %s239_s4 = inlined_call_operand.vmem [shape: f32[1,32], index: 4, kind: input, shape index: {}]   ;;  %s240_s5 = inlined_call_operand.vmem [shape: f32[1,32], index: 5, kind: input, shape index: {}]   ;;  %s241_s6 = inlined_call_operand.vmem [shape: f32[16,32], index: 6, kind: output, shape index: {}]  }
   0x1   :  { %v148_v0 = vld [vmem:[%s235_s1 + $0x8] sm:$0xff]  ;;  %v147_v1 = vld [vmem:[%s235_s1] sm:$0xff]  ;;  %153 = vrcp.f32 %v159_v16 }
   0x2   :  { %57 = vmatpush.bf16.msra.mxu0 %v148_v0  ;;  %v24_v2 = vld [vmem:[%s236_s0] sm:$0xff]  ;;  %v25_v3 = vld [vmem:[%s236_s0 + $0x8] sm:$0xff] }
   0x3   :  { %v26_v4 = vpack.c.bf16 %v25_v3, %v24_v2  ;;  %v150_v5 = vld [vmem:[%s237_s2] ss:$0 sm:$0xff]  ;;  %v66_v12 = vld [vmem:[%s238_s3 + $0x8] sm:$0xff] }
   0x4   :  { %v65_v7 = vld [vmem:[%s238_s3] sm:$0xff] }
   0x5   :  { %v151_v47 = vld [vmem:[%s239_s4] ss:$0 sm:$0xff] }
   0x6   :  { %58 = vmatpush.bf16.msra.mxu0 %v147_v1  ;;  %v152_v50 = vld [vmem:[%s240_s5] ss:$0 sm:$0xff] }
   0x7   :  { %v154_v17 = vpop.eup %153 }
   0x8   :  { %v78_v18 = vmul.f32 32.0, %v154_v17  ;;  %vm82_vm1 = vweird.f32 %v154_v17 }
   0x9   :  { %146 = vmatmul.msk.bf16.vlgmr.msra.gmra.mxu0 %vm47_vm0, %v26_v4 }
   0xa   :  { %v79_v19 = vsub.f32 1.0, %v78_v18 }
   0xc   :  { %v80_v20 = vmul.f32 %v154_v17, %v79_v19 }
   0xe   :  { %v81_v21 = vadd.f32 %v154_v17, %v80_v20 }
  0x10   :  { %v83_v22 = vsel %vm82_vm1, %v154_v17, %v81_v21 }
  0x86   :  { %v60_v6 = vpop.f32.mrf.mxu0 }
  0x87   :  { %v61_v8 = vadd.f32 %v150_v5, %v60_v6 }
  0x89   :  { %v67_v9 = vadd.f32 %v65_v7, %v61_v8 }
  0x8b   :  { %v71_v10 = vsel %vm47_vm0, %v67_v9, 0.0 }
  0x8c   :  { %72 = vadd.xlane.f32.xlu0 %v71_v10 }
  0x8e   :  { %v62_v11 = vpop.f32.mrf.mxu0 }
  0x8f   :  { %v63_v13 = vadd.f32 %v150_v5, %v62_v11 }
  0x91   :  { %v68_v14 = vadd.f32 %v66_v12, %v63_v13 }
  0x93   :  { %v74_v15 = vsel %vm47_vm0, %v68_v14, 0.0 }
  0x94   :  { %75 = vadd.xlane.f32.xlu0 %v74_v15 }
  0xff   :  { %v73_v23 = vpop.xlane.xlu0 %72 }
 0x100   :  { %v84_v24 = vmul.f32 %v83_v22, %v73_v23 }
 0x102   :  { %v86_v25 = vsub.f32 %v67_v9, %v84_v24 }
 0x104   :  { %v88_v26 = vmul.f32 %v86_v25, %v86_v25 }
 0x106   :  { %v90_v27 = vsel %vm47_vm0, %v88_v26, 0.0 }
 0x107   :  { %91 = vadd.xlane.f32.xlu1 %v90_v27  ;;  %v76_v28 = vpop.xlane.xlu0 %75 }
 0x108   :  { %v85_v29 = vmul.f32 %v83_v22, %v76_v28 }
 0x10a   :  { %v87_v30 = vsub.f32 %v68_v14, %v85_v29 }
 0x10c   :  { %v89_v31 = vmul.f32 %v87_v30, %v87_v30 }
 0x10e   :  { %v93_v32 = vsel %vm47_vm0, %v89_v31, 0.0 }
 0x10f   :  { %94 = vadd.xlane.f32.xlu1 %v93_v32 }
 0x17a   :  { %v92_v33 = vpop.xlane.xlu1 %91 }
 0x17b   :  { %v96_v34 = vmul.f32 %v92_v33, %v83_v22 }
 0x17d   :  { %v98_v35 = vadd.f32 1e-05, %v96_v34 }
 0x17f   :  { %155 = vrsqrt.f32 %v98_v35  ;;  %vm106_vm3 = vweird.f32 %v98_v35 }
 0x182   :  { %v95_v36 = vpop.xlane.xlu1 %94 }
 0x183   :  { %v97_v37 = vmul.f32 %v95_v36, %v83_v22 }
 0x185   :  { %v156_v38 = vpop.eup %155  ;;  %v99_v39 = vadd.f32 1e-05, %v97_v37 }
 0x186   :  { %v101_v40 = vmul.f32 %v156_v38, %v98_v35  ;;  %vm107_vm2 = vweird.f32 %v156_v38 }
 0x187   :  { %157 = vrsqrt.f32 %v99_v39  ;;  %vm108_vm4 = vmor %vm106_vm3, %vm107_vm2  ;;  %vm116_vm6 = vweird.f32 %v99_v39 }
 0x188   :  { %v102_v41 = vmul.f32 %v156_v38, %v101_v40 }
 0x18a   :  { %v103_v42 = vmul.f32 0.5, %v102_v41 }
 0x18c   :  { %v104_v43 = vsub.f32 1.5, %v103_v42 }
 0x18d   :  { %v158_v44 = vpop.eup %157 }
 0x18e   :  { %v105_v45 = vmul.f32 %v156_v38, %v104_v43  ;;  %v111_v46 = vmul.f32 %v158_v44, %v99_v39  ;;  %vm117_vm5 = vweird.f32 %v158_v44 }
 0x18f   :  { %vm118_vm7 = vmor %vm116_vm6, %vm117_vm5 }
 0x190   :  { %v109_v48 = vsel %vm108_vm4, %v156_v38, %v105_v45  ;;  %v112_v49 = vmul.f32 %v158_v44, %v111_v46 }
 0x191   :  { %v120_v51 = vmul.f32 %v109_v48, %v86_v25 }
 0x192   :  { %v113_v52 = vmul.f32 0.5, %v112_v49 }
 0x193   :  { %v125_v53 = vmul.f32 %v151_v47, %v120_v51 }
 0x194   :  { %v114_v54 = vsub.f32 1.5, %v113_v52 }
 0x195   :  { %v130_v55 = vadd.f32 %v152_v50, %v125_v53 }
 0x196   :  { %v115_v56 = vmul.f32 %v158_v44, %v114_v54 }
 0x197   :  { %132 = vst.msk [vmem:[%s241_s6] sm:$0xff] %vm47_vm0, %v130_v55 }
 0x198   :  { %v119_v57 = vsel %vm118_vm7, %v158_v44, %v115_v56 }
 0x199   :  { %v121_v58 = vmul.f32 %v119_v57, %v87_v30 }
 0x19b   :  { %v126_v59 = vmul.f32 %v151_v47, %v121_v58 }
 0x19d   :  { %v131_v60 = vadd.f32 %v152_v50, %v126_v59 }
 0x19f   :  { %133 = vst.msk [vmem:[%s241_s6 + $0x8] sm:$0xff] %vm47_vm0, %v131_v60 }

// kernel: block_forward.7
= control target key start
LH: loop header
LB: loop body
LE: loop exit
PB: predicated region body
PF: predicated region fallthrough
CT: control target
= control target key end

     0   :  { %s460_s0 = inlined_call_operand.vmem [shape: f32[16,32], index: 0, kind: input, shape index: {}]   ;;  %s461_s1 = inlined_call_operand.vmem [shape: bf16[32,128], index: 1, kind: input, shape index: {}]   ;;  %s462_s2 = inlined_call_operand.vmem [shape: f32[1,128], index: 2, kind: input, shape index: {}]   ;;  %s463_s3 = inlined_call_operand.vmem [shape: bf16[128,32], index: 3, kind: input, shape index: {}]   ;;  %s464_s4 = inlined_call_operand.vmem [shape: f32[1,32], index: 4, kind: input, shape index: {}]   ;;  %s465_s5 = inlined_call_operand.vmem [shape: f32[1,32], index: 5, kind: input, shape index: {}]   ;;  %s466_s6 = inlined_call_operand.vmem [shape: f32[1,32], index: 6, kind: input, shape index: {}]   ;;  %s467_s7 = inlined_call_operand.hbm [shape: f32[16,32], index: 7, kind: output, shape index: {}]  }
   0x1   :  { %v303_v0 = vld [vmem:[%s461_s1 + $0x8] sm:$0xff]  ;;  %v302_v1 = vld [vmem:[%s461_s1] sm:$0xff]  ;;  %v311_v2 = vld [vmem:[%s463_s3 + $0x38] sm:$0xff] }
   0x2   :  { %68 = vmatpush.bf16.msra.mxu0 %v303_v0  ;;  %v35_v3 = vld [vmem:[%s460_s0] sm:$0xff]  ;;  %v36_v4 = vld [vmem:[%s460_s0 + $0x8] sm:$0xff]  ;;  %145 = vmatpush.bf16.msra.mxu1 %v311_v2  ;;  %v310_v5 = vld [vmem:[%s463_s3 + $0x30] sm:$0xff] }
   0x3   :  { %12 = vsyncpa [#allocation4], 0  ;;  %v37_v6 = vpack.c.bf16 %v36_v4, %v35_v3  ;;  %vm32_vm0 = vcmask 261120   ;;  %v309_v7 = vld [vmem:[%s463_s3 + $0x28] sm:$0xff]  ;;  %v308_v8 = vld [vmem:[%s463_s3 + $0x20] sm:$0xff]  ;;  %v353_v13 = vmov 0.0  }
   0x4   :  { %v307_v9 = vld [vmem:[%s463_s3 + $0x18] sm:$0xff]  ;;  %v306_v10 = vld [vmem:[%s463_s3 + $0x10] sm:$0xff]  ;;  %v305_v11 = vld [vmem:[%s463_s3 + $0x8] sm:$0xff]  ;;  %33 = vst.msk [vmem:[#allocation2] sm:$0xff] %vm32_vm0, %v353_v13  ;;  %v354_v37 = vmov 32.0   ;;  %s249_s8 = sshll.u32 %s467_s7, 4  ;;  %s250_s8 = int_to_ptr.hbm [resolvable:$true] %s249_s8 }
   0x5   :  { %v304_v12 = vld [vmem:[%s463_s3] sm:$0xff]  ;;  %34 = vst.msk [vmem:[#allocation2 + $0x8] sm:$0xff] %vm32_vm0, %v353_v13  ;;  %321 = vrcp.f32 %v354_v37  ;;  %s357_s9 = smov 8  }
   0x6   :  { %69 = vmatpush.bf16.msra.mxu0 %v302_v1  ;;  %146 = vmatpush.bf16.msra.mxu1 %v310_v5  ;;  %v317_v15 = vld [vmem:[%s462_s2] ss:$0 sm:$0xff] }
   0x7   :  { %v318_v28 = vld [vmem:[%s464_s4] ss:$0 sm:$0xff] }
   0x9   :  { %269 = vmatmul.msk.bf16.vlgmr.msra.gmra.mxu0 %vm32_vm0, %v37_v6 }
   0xa   :  { %147 = vmatpush.bf16.msra.mxu1 %v309_v7 }
   0xb   :  { %v78_v22 = vld [vmem:[#allocation2] sm:$0xff]  ;;  %v322_v38 = vpop.eup %321 }
   0xc   :  { %v79_v25 = vld [vmem:[#allocation2 + $0x8] sm:$0xff]  ;;  %v187_v39 = vmul.f32 32.0, %v322_v38  ;;  %vm191_vm1 = vweird.f32 %v322_v38 }
   0xe   :  { %148 = vmatpush.bf16.msra.mxu1 %v308_v8  ;;  %v188_v40 = vsub.f32 1.0, %v187_v39  ;;  %v320_v8 = vld [vmem:[%s466_s6] ss:$0 sm:$0xff]  ;;  %s356_s6 = smov 128  }
  0x10   :  { %v189_v41 = vmul.f32 %v322_v38, %v188_v40 }
  0x12   :  { %149 = vmatpush.bf16.msra.mxu1 %v307_v9  ;;  %v190_v42 = vadd.f32 %v322_v38, %v189_v41 }
  0x14   :  { %v192_v43 = vsel %vm191_vm1, %v322_v38, %v190_v42 }
  0x16   :  { %150 = vmatpush.bf16.msra.mxu1 %v306_v10 }
  0x1a   :  { %151 = vmatpush.bf16.msra.mxu1 %v305_v11 }
  0x1e   :  { %152 = vmatpush.bf16.msra.mxu1 %v304_v12 }
  0x86   :  { %v71_v14 = vpop.f32.mrf.mxu0 }
  0x87   :  { %v72_v16 = vadd.f32 %v317_v15, %v71_v14 }
  0x89   :  { %v76_v19 = vmax.f32 %v72_v16, 0.0 }
  0x8e   :  { %v73_v17 = vpop.f32.mrf.mxu0 }
  0x8f   :  { %v74_v18 = vadd.f32 %v317_v15, %v73_v17 }
  0x91   :  { %v77_v20 = vmax.f32 %v74_v18, 0.0 }
  0x93   :  { %v80_v21 = vpack.c.bf16 %v77_v20, %v76_v19 }
  0x95   :  { %153 = vmatmul.bf16.vlgmr.msra.gmra.mxu1 %v80_v21 }
 0x112   :  { %v154_v23 = vpop.f32.mrf.mxu1 }
 0x113   :  { %v159_v24 = vadd.f32 %v154_v23, %v78_v22 }
 0x115   :  { %161 = vst.msk [vmem:[#allocation2] sm:$0xff] %vm32_vm0, %v159_v24 }
 0x11a   :  { %v156_v26 = vpop.f32.mrf.mxu1 }
 0x11b   :  { %v160_v27 = vadd.f32 %v156_v26, %v79_v25 }
 0x11c   :  { %v168_v29 = vld [vmem:[#allocation2] sm:$0xff] }
 0x11d   :  { %162 = vst.msk [vmem:[#allocation2 + $0x8] sm:$0xff] %vm32_vm0, %v160_v27  ;;  %v170_v30 = vadd.f32 %v168_v29, %v35_v3 }
 0x11f   :  { %v176_v31 = vadd.f32 %v318_v28, %v170_v30 }
 0x121   :  { %v180_v32 = vsel %vm32_vm0, %v176_v31, 0.0 }
 0x122   :  { %181 = vadd.xlane.f32.xlu0 %v180_v32 }
 0x124   :  { %v169_v33 = vld [vmem:[#allocation2 + $0x8] sm:$0xff] }
 0x125   :  { %v171_v34 = vadd.f32 %v169_v33, %v36_v4  ;;  %v319_v4 = vld [vmem:[%s465_s5] ss:$0 sm:$0xff]  ;;  %s355_s5 = smov [#allocation3]  }
 0x126   :  { %s247_s28 = sshll.u32 %s355_s5, 4  ;;  %s248_s28 = int_to_ptr.vmem [resolvable:$true] %s247_s28 }
 0x127   :  { %v177_v35 = vadd.f32 %v318_v28, %v171_v34 }
 0x129   :  { %v183_v36 = vsel %vm32_vm0, %v177_v35, 0.0 }
 0x12a   :  { %184 = vadd.xlane.f32.xlu0 %v183_v36 }
 0x195   :  { %v182_v44 = vpop.xlane.xlu0 %181 }
 0x196   :  { %v193_v45 = vmul.f32 %v192_v43, %v182_v44 }
 0x198   :  { %v195_v46 = vsub.f32 %v176_v31, %v193_v45 }
 0x19a   :  { %v197_v47 = vmul.f32 %v195_v46, %v195_v46 }
 0x19c   :  { %v199_v48 = vsel %vm32_vm0, %v197_v47, 0.0 }
 0x19d   :  { %200 = vadd.xlane.f32.xlu1 %v199_v48  ;;  %v185_v49 = vpop.xlane.xlu0 %184 }
 0x19e   :  { %v194_v50 = vmul.f32 %v192_v43, %v185_v49 }
 0x1a0   :  { %v196_v51 = vsub.f32 %v177_v35, %v194_v50 }
 0x1a2   :  { %v198_v52 = vmul.f32 %v196_v51, %v196_v51 }
 0x1a4   :  { %v202_v53 = vsel %vm32_vm0, %v198_v52, 0.0 }
 0x1a5   :  { %203 = vadd.xlane.f32.xlu1 %v202_v53 }
 0x210   :  { %v201_v54 = vpop.xlane.xlu1 %200 }
 0x211   :  { %v205_v55 = vmul.f32 %v201_v54, %v192_v43 }
 0x213   :  { %v207_v56 = vadd.f32 1e-05, %v205_v55 }
 0x215   :  { %323 = vrsqrt.f32 %v207_v56  ;;  %vm215_vm3 = vweird.f32 %v207_v56 }
 0x218   :  { %v204_v57 = vpop.xlane.xlu1 %203 }
 0x219   :  { %v206_v58 = vmul.f32 %v204_v57, %v192_v43 }
 0x21b   :  { %v324_v59 = vpop.eup %323  ;;  %v208_v60 = vadd.f32 1e-05, %v206_v58 }
 0x21c   :  { %v210_v61 = vmul.f32 %v324_v59, %v207_v56  ;;  %vm216_vm2 = vweird.f32 %v324_v59 }
 0x21d   :  { %325 = vrsqrt.f32 %v208_v60  ;;  %vm217_vm4 = vmor %vm215_vm3, %vm216_vm2  ;;  %vm225_vm6 = vweird.f32 %v208_v60 }
 0x21e   :  { %v211_v62 = vmul.f32 %v324_v59, %v210_v61 }
 0x220   :  { %v212_v63 = vmul.f32 0.5, %v211_v62 }
 0x222   :  { %v213_v0 = vsub.f32 1.5, %v212_v63 }
 0x223   :  { %v326_v1 = vpop.eup %325 }
 0x224   :  { %v214_v2 = vmul.f32 %v324_v59, %v213_v0  ;;  %v220_v3 = vmul.f32 %v326_v1, %v208_v60  ;;  %vm226_vm5 = vweird.f32 %v326_v1 }
 0x225   :  { %vm227_vm7 = vmor %vm225_vm6, %vm226_vm5 }
 0x226   :  { %v218_v5 = vsel %vm217_vm4, %v324_v59, %v214_v2  ;;  %v221_v6 = vmul.f32 %v326_v1, %v220_v3 }
 0x227   :  { %v229_v7 = vmul.f32 %v218_v5, %v195_v46 }
 0x228   :  { %v222_v9 = vmul.f32 0.5, %v221_v6 }
 0x229   :  { %v234_v10 = vmul.f32 %v319_v4, %v229_v7 }
 0x22a   :  { %v223_v11 = vsub.f32 1.5, %v222_v9 }
 0x22b   :  { %v239_v12 = vadd.f32 %v320_v8, %v234_v10 }
 0x22c   :  { %v224_v13 = vmul.f32 %v326_v1, %v223_v11 }
 0x22d   :  { %241 = vst.msk [vmem:[#allocation3] sm:$0xff] %vm32_vm0, %v239_v12 }
 0x22e   :  { %v228_v14 = vsel %vm227_vm7, %v326_v1, %v224_v13 }
 0x22f   :  { %v230_v15 = vmul.f32 %v228_v14, %v196_v51 }
 0x231   :  { %v235_v16 = vmul.f32 %v319_v4, %v230_v15 }
 0x233   :  { %v240_v17 = vadd.f32 %v320_v8, %v235_v16 }
 0x235   :  { %242 = vst.msk [vmem:[#allocation3 + $0x8] sm:$0xff] %vm32_vm0, %v240_v17 }
 0x236   :  { %255 = dma.vmem_to_hbm [thread:$0]  %s248_s28, 256, %s250_s8, [#allocation4], %s356_s6, %s356_s6, %s357_s9  }
 0x237   :  { %351 = dma.done.wait [#allocation4], 256  }
 0x238   :  { %352 = vsyncadd [#allocation4], 4294967040 }
 0x239   :  { %260 = vsyncpa [#allocation4], 1 }

</bundles_post_ra>
